<compile_context>
chip_gen: v7x
topology: tpu7x:2x2x1
jax: 0.10.0
libtpu: 0.0.40
codegen_flags: <defaults>
</compile_context>

<pallas_src>
import jax
import jax.numpy as jnp
from jax.experimental import pallas as pl
from jax.experimental.pallas import tpu as pltpu

_LANE = 128      # TPU lane width
_SUBLANE = 8     # f32 sublane count


def _fixed_weights_kernel(x_ref, w_ref, o_ref):
    # x_ref: (TB, C) in x's dtype; w_ref: (8, C) f32 (8 identical rows);
    # o_ref: (1, TB) f32, lane-dense.
    x = x_ref[...].astype(jnp.float32)   # torch: f32 weights promote x to f32
    # "NT" dot: (8, C) . (TB, C)^T -> (8, TB), f32 accumulation on the MXU.
    acc = jax.lax.dot_general(
        w_ref[...], x,
        dimension_numbers=(((1,), (1,)), ((), ())),
        preferred_element_type=jnp.float32)
    # All 8 rows are identical; keep row 0 -> (1, TB) lane-dense result.
    o_ref[...] = acc[0:1, :]


def _vmem_budgets():
    """(per_buffer_budget_bytes, vmem_limit_cap_bytes), generation aware."""
    try:
        cap = pltpu.get_tpu_info().vmem_capacity_bytes
    except Exception:
        cap = 0
    if cap >= (96 << 20):          # 128 MiB parts: v5e / v6e -> go big
        return 16 << 20, 60 << 20
    return 7 << 20, 36 << 20       # 64 MiB parts (v7x) or unknown -> conservative


def _choose_batch_tile(B, C, itemsize, per_buffer_budget):
    """Batch tile sized by bytes, 128-row aligned, with >=2 grid tiles whenever
    B is large enough (keeps v7x's 2nd TensorCore busy, lets double-buffering
    overlap DMA with compute)."""
    row_bytes = max(1, C * itemsize)
    tb = per_buffer_budget // row_bytes
    if tb >= B:
        if B < 2 * _LANE:
            return B                              # single full block (always legal)
        n_tiles = 4 if B >= 4 * _LANE else 2
        tb = pl.cdiv(B, n_tiles)
        return ((tb + _LANE - 1) // _LANE) * _LANE
    # Steady state (DMA bound): biggest 128-row-aligned tile within budget.
    # (Very large C falls back to the 128-row minimum tile.)
    return max(_LANE, (tb // _LANE) * _LANE)


def fixed_weights_forward(weights, x):
    """weights: (C,) stored as f32 (matches torch module); x: (B, C) -> (B,) f32."""
    B, C = x.shape
    assert weights.shape == (C,)

    w = jnp.asarray(weights, dtype=jnp.float32).reshape(1, C)
    w8 = jnp.broadcast_to(w, (_SUBLANE, C))       # lane-dense, sublane-replicated

    itemsize = jnp.dtype(x.dtype).itemsize
    per_buffer_budget, vmem_cap = _vmem_budgets()
    tb = _choose_batch_tile(B, C, itemsize, per_buffer_budget)
    num_tiles = pl.cdiv(B, tb)

    # Scoped-VMEM accounting, including sublane/lane padding of every block.
    tb_pad = ((tb + _LANE - 1) // _LANE) * _LANE
    needed = (2 * tb * C * itemsize               # double-buffered x tile
              + 2 * _SUBLANE * C * 4              # (8, C) weights block
              + 2 * _SUBLANE * tb_pad * 4         # (1, tb) out block (sublane-padded)
              + (2 << 20))                        # headroom
    vmem_limit = int(min(vmem_cap, max(needed, 4 << 20)))

    bytes_accessed = B * C * itemsize + _SUBLANE * C * 4 + B * 4
    cost = pl.CostEstimate(flops=2 * B * C, transcendentals=0,
                           bytes_accessed=bytes_accessed)

    out = pl.pallas_call(
        _fixed_weights_kernel,
        out_shape=jax.ShapeDtypeStruct((1, B), jnp.float32),
        grid=(num_tiles,),
        in_specs=[
            pl.BlockSpec((tb, C), lambda i: (i, 0)),         # x, streamed over B
            pl.BlockSpec((_SUBLANE, C), lambda i: (0, 0)),   # weights, resident
        ],
        out_specs=pl.BlockSpec((1, tb), lambda i: (0, i)),   # lane-dense output row
        compiler_params=pltpu.CompilerParams(
            dimension_semantics=("parallel",),               # v7x: 2 TCs share tiles
            vmem_limit_bytes=vmem_limit,
        ),
        cost_estimate=cost,
    )(x, w8)
    return out.reshape(B)


if __name__ == "__main__":
    key = jax.random.PRNGKey(0)

    def check(B, C, dtype, atol, rtol):
        kx, kw = jax.random.split(jax.random.fold_in(key, B * 131 + C), 2)
        x = jax.random.normal(kx, (B, C), dtype=jnp.float32).astype(dtype)
        weights = jax.random.normal(kw, (C,), dtype=jnp.float32)

        out = jax.block_until_ready(fixed_weights_forward(weights, x))

        # Pure-JAX reference of the exact PyTorch semantics (f32 math).
        ref = jnp.sum(weights[None, :] * x.astype(jnp.float32), axis=1)
        assert out.shape == (B,) and out.dtype == jnp.float32
        assert jnp.allclose(out, ref, atol=atol, rtol=rtol), (B, C, str(dtype))

    check(16, 128, jnp.float32, 1e-4, 1e-5)       # tiny: single full block
    check(400, 128, jnp.float32, 1e-4, 1e-5)      # multi-tile grid + partial last tile
    check(256, 384, jnp.bfloat16, 1e-2, 1e-2)     # bf16 x, multi-tile grid

    print("KERNEL_OK")
</pallas_src>

<mosaic_0001>
module attributes {stable_mosaic.version = 11 : i64} {
  func.func @_fixed_weights_kernel(%arg0: i32, %arg1: memref<16x128xf32, #tpu.memory_space<vmem>>, %arg2: memref<8x128xf32, #tpu.memory_space<vmem>>, %arg3: memref<1x16xf32, #tpu.memory_space<vmem>>) attributes {dimension_semantics = [#tpu.dimension_semantics<parallel>], iteration_bounds = array<i64: 1>, scalar_prefetch = 0 : i64, scratch_operands = 0 : i64, tpu.core_type = #tpu.core_type<tc>, window_params = [{transform_indices = @transform_0, window_bounds = array<i64: 16, 128>}, {pipeline_mode = #tpu.pipeline_mode<synchronous>, transform_indices = @transform_1, window_bounds = array<i64: 8, 128>}, {transform_indices = @transform_2, window_bounds = array<i64: 1, 16>}]} {
    %c0 = arith.constant 0 : index
    %c0_0 = arith.constant 0 : index
    %0 = vector.load %arg1[%c0, %c0_0] : memref<16x128xf32, #tpu.memory_space<vmem>>, vector<16x128xf32>
    %c0_1 = arith.constant 0 : index
    %c0_2 = arith.constant 0 : index
    %1 = vector.load %arg2[%c0_1, %c0_2] : memref<8x128xf32, #tpu.memory_space<vmem>>, vector<8x128xf32>
    %cst = arith.constant dense<0.000000e+00> : vector<8x16xf32>
    %2 = tpu.matmul %1, %0, %cst {dimension_numbers = #tpu.dot_dimension_numbers<[1], [1], [0], [0], [0, 0, 1, 0], [], []>} : vector<8x128xf32>, vector<16x128xf32>, vector<8x16xf32> -> vector<8x16xf32>
    %3 = vector.extract_strided_slice %2 {offsets = [0, 0], sizes = [1, 16], strides = [1, 1]} : vector<8x16xf32> to vector<1x16xf32>
    %c0_3 = arith.constant 0 : index
    %c0_4 = arith.constant 0 : index
    %4 = vector.load %arg3[%c0_3, %c0_4] : memref<1x16xf32, #tpu.memory_space<vmem>>, vector<1x16xf32>
    tpu.vector_store %arg3[%c0_3, %c0_4], %3 {strides = array<i32>} : memref<1x16xf32, #tpu.memory_space<vmem>>, vector<1x16xf32>,
    return
  }
  func.func @transform_0(%arg0: i32) -> (i32, i32) {
    %c0_i32 = arith.constant 0 : i32
    %c0_i32_0 = arith.constant 0 : i32
    return %arg0, %c0_i32 : i32, i32
  }
  func.func @transform_1(%arg0: i32) -> (i32, i32) {
    %c0_i32 = arith.constant 0 : i32
    %c0_i32_0 = arith.constant 0 : i32
    %c0_i32_1 = arith.constant 0 : i32
    return %c0_i32, %c0_i32_0 : i32, i32
  }
  func.func @transform_2(%arg0: i32) -> (i32, i32) {
    %c0_i32 = arith.constant 0 : i32
    %c0_i32_0 = arith.constant 0 : i32
    return %c0_i32, %arg0 : i32, i32
  }
}

</mosaic_0001>

<bundles_post_ra>
// kernel: tpu_custom_call.1
= control target key start
LH: loop header
LB: loop body
LE: loop exit
PB: predicated region body
PF: predicated region fallthrough
CT: control target
= control target key end

     0   :  { %7 = vsyncpa [#allocation3], 0  ;;  %s281_s0 = inlined_call_operand.hbm [shape: f32[16,128], index: 0, kind: input, shape index: {}]   ;;  %s282_s1 = inlined_call_operand.hbm [shape: f32[8,128], index: 1, kind: input, shape index: {}]   ;;  %s283_s2 = inlined_call_operand.hbm [shape: f32[1,16], index: 2, kind: output, shape index: {}]  }
   0x1   :  { %8 = vsyncpa [#allocation6], 0 }
   0x2   :  { %9 = vsyncpa [#allocation4], 0  ;;  %s222_s9 = smov [#allocation2]   ;;  %s150_s13 = scalar_lea.hbm %s281_s0, 256 }
   0x3   :  { %s15_s10 = sshll.u32 %s222_s9, 4  ;;  %p151_p0 = scmp.ne.s32.totalorder %s281_s0, %s150_s13  ;;  %s16_s10 = int_to_ptr.vmem [resolvable:$true] %s15_s10 }
   0x4   :  { %p154_p1 = scmp.lt.u32.totalorder %s150_s13, %s281_s0 }
   0x6   :  { %p156_p2 = pnand %p154_p1, %p151_p0 }
   0x8   :  { %159 = shalt.err (!%p156_p2)
}
   0x9   :  { %s160_s18 = scalar_lea.vmem %s16_s10, 256  ;;  %p165_p4 = scmp.lt.s32.totalorder %s16_s10, %s16_s10 }
   0xa   :  { %p161_p3 = scmp.ne.s32.totalorder %s16_s10, %s160_s18  ;;  %p166_p5 = scmp.lt.s32.totalorder %s160_s18, %s160_s18 }
   0xc   :  { %p167_p6 = por %p166_p5, %p165_p4 }
   0xe   :  { %p168_p7 = pnand %p167_p6, %p161_p3 }
  0x10   :  { %171 = shalt.err (!%p168_p7)
}
  0x11   :  { %s223_s19 = smov 128   ;;  %s224_s20 = smov 8  }
  0x12   :  { %21 = dma.hbm_to_vmem [thread:$0]  %s281_s0, 256, %s16_s10, [#allocation3], %s223_s19, %s223_s19, %s224_s20  }
  0x13   :  { %s225_s23 = smov [#allocation5]   ;;  %s172_s27 = scalar_lea.hbm %s282_s1, 128 }
  0x14   :  { %s28_s24 = sshll.u32 %s225_s23, 4  ;;  %p173_p8 = scmp.ne.s32.totalorder %s282_s1, %s172_s27  ;;  %s29_s24 = int_to_ptr.vmem [resolvable:$true] %s28_s24 }
  0x15   :  { %p176_p9 = scmp.lt.u32.totalorder %s172_s27, %s282_s1 }
  0x17   :  { %p178_p10 = pnand %p176_p9, %p173_p8 }
  0x19   :  { %181 = shalt.err (!%p178_p10)
}
  0x1a   :  { %s182_s4 = scalar_lea.vmem %s29_s24, 128  ;;  %p187_p12 = scmp.lt.s32.totalorder %s29_s24, %s29_s24 }
  0x1b   :  { %p183_p11 = scmp.ne.s32.totalorder %s29_s24, %s182_s4  ;;  %p188_p13 = scmp.lt.s32.totalorder %s182_s4, %s182_s4 }
  0x1d   :  { %p189_p0 = por %p188_p13, %p187_p12 }
  0x1f   :  { %p190_p1 = pnand %p189_p0, %p183_p11 }
  0x21   :  { %193 = shalt.err (!%p190_p1)
}
  0x22   :  { %31 = dma.hbm_to_vmem [thread:$0]  %s282_s1, 128, %s29_s24, [#allocation6]  }
  0x23   :  { %216 = dma.done.wait [#allocation3], 256  }
  0x24   :  { %217 = vsyncadd [#allocation3], 4294967040 }
  0x25   :  { %218 = dma.done.wait [#allocation6], 128  }
  0x26   :  { %219 = vsyncadd [#allocation6], 4294967168  ;;  %v226_v0 = vmov 0.0|0.0   ;;  %vm227_vm0 = vmmov 0   ;;  %v228_v1 = vmov 0.0   ;;  %v38_v2 = vld [vmem:[#allocation2] sm:$0xff] }
  0x27   :  { %139 = vmatprep.subr.bf16.mxu0 %v226_v0  ;;  %136 = vmatprep.mubr.msk.f32.mxu0 %vm227_vm0, %v228_v1  ;;  %v39_v3 = vld [vmem:[#allocation2 + $0x8] sm:$0xff]  ;;  %v40_v5 = vld [vmem:[#allocation5] sm:$0xff]  ;;  %s229_s6 = smov [#allocation7]   ;;  %vm111_vm1 = vcmask 122880  }
  0x28   :  { %v140_v4 = vpack.c.bf16 %v39_v3, %v38_v2  ;;  %s119_s7 = sshll.u32 %s229_s6, 4  ;;  %s120_s7 = int_to_ptr.vmem [resolvable:$true] %s119_s7 }
  0x29   :  { %s194_s1 = scalar_lea.vmem %s120_s7, 16  ;;  %s198_s8 = scalar_lea.vmem %s120_s7, 32 }
  0x2a   :  { %141 = vmatpush3.bf16.xpose.msra.mxu0 %v140_v4  ;;  %p195_p2 = scmp.ne.s32.totalorder %s120_s7, %s194_s1  ;;  %p199_p3 = scmp.lt.s32.totalorder %s120_s7, %s120_s7 }
  0x2b   :  { %p200_p4 = scmp.lt.s32.totalorder %s198_s8, %s194_s1 }
  0x2d   :  { %p201_p5 = por %p200_p4, %p199_p3 }
  0x2f   :  { %p202_p6 = pnand %p201_p5, %p195_p2 }
  0x31   :  { %137 = vmatmul.mubr.f32.vlgmr.msra.gmra.mrb[0].mxu0 %v40_v5 }
 0x104   :  { %v107_v6 = vpop.f32.mrb[0].mxu0 }
 0x105   :  { %v138_v7 = vpop.f32.mrb[1].mxu0  ;;  %112 = vst.msk [vmem:[#allocation7] sm:$0x1] %vm111_vm1, %v107_v6 }
 0x106   :  { %205 = shalt.err (!%p202_p6)
}
 0x107   :  { %s206_s11 = scalar_lea.hbm %s283_s2, 16 }
 0x108   :  { %p207_p7 = scmp.ne.s32.totalorder %s283_s2, %s206_s11  ;;  %p210_p8 = scmp.lt.u32.totalorder %s206_s11, %s283_s2 }
 0x10a   :  { %p212_p9 = pnand %p210_p8, %p207_p7 }
 0x10c   :  { %215 = shalt.err (!%p212_p9)
}
 0x10d   :  { %122 = dma.vmem_to_hbm [thread:$0]  %s120_s7, 16, %s283_s2, [#allocation4]  }
 0x10e   :  { %220 = dma.done.wait [#allocation4], 16  }
 0x10f   :  { %221 = vsyncadd [#allocation4], 4294967280 }
 0x110   :  { %126 = vsyncpa [#allocation3], 1 }
 0x111   :  { %127 = vsyncpa [#allocation6], 1 }
 0x112   :  { %128 = vsyncpa [#allocation4], 1 }

</bundles_post_ra>
